<compile_context>
chip_gen: v6e
topology: v6e:2x2x1
jax: 0.10.0
libtpu: 0.0.40
codegen_flags: <defaults>
</compile_context>

<pallas_src>
import jax
import jax.numpy as jnp
from jax.experimental import pallas as pl
from jax.experimental.pallas import tpu as pltpu


def _round_up(x, m):
    return ((x + m - 1) // m) * m


# Row layout of the packed small-operand block (one (5, W) f32 array instead
# of five tiny DMA'd operands).
_ROW_B1, _ROW_B2, _ROW_W3, _ROW_B3, _ROW_INV_NORM = range(5)


def critic_kernel(x_ref, w1_ref, w2_ref, p_ref, o_ref):
    d = x_ref.shape[1]
    fc1 = w1_ref.shape[1]
    fc2 = w2_ref.shape[1]

    b1 = p_ref[_ROW_B1:_ROW_B1 + 1, :fc1]                    # (1, fc1) f32
    b2 = p_ref[_ROW_B2:_ROW_B2 + 1, :fc2]                    # (1, fc2) f32
    w3 = p_ref[_ROW_W3:_ROW_W3 + 1, :fc2]                    # (1, fc2) f32
    b3 = p_ref[_ROW_B3:_ROW_B3 + 1, 0:1]                     # (1, 1)  f32
    inv_norm = p_ref[_ROW_INV_NORM:_ROW_INV_NORM + 1, :d]    # (1, d)  f32

    # Normalize in f32 (VPU mul, hidden under the MXU), then cast to bf16
    # in-kernel for the MXU operands.
    x = (x_ref[...] * inv_norm).astype(jnp.bfloat16)          # (tb, d)

    # fc1 + ReLU: bf16 MXU operands, f32 accumulate / elementwise.
    h1 = jnp.dot(x, w1_ref[...], preferred_element_type=jnp.float32) + b1
    h1 = jnp.maximum(h1, 0.0)

    # fc2 + ReLU.
    h2 = jnp.dot(h1.astype(jnp.bfloat16), w2_ref[...],
                 preferred_element_type=jnp.float32) + b2
    h2 = jnp.maximum(h2, 0.0)

    # fc3 (out_features == 1): VPU multiply + lane reduction beats an N=1
    # MXU matmul.
    o_ref[...] = jnp.sum(h2 * w3, axis=-1, keepdims=True) + b3


def prepare_critic_params(params, norm):
    """One-time (per parameter update) prep, hoisted out of the hot path.

    Casts the matmul weights to bf16 and packs all tiny per-call operands
    (b1, b2, w3, b3, 1/norm) into a single (5, W) f32 block so the kernel
    takes 4 operands instead of 8.  Weights are stored (in_features,
    out_features) so the kernel computes x @ W + b (== PyTorch x @ W.T + b).
    """
    D, fc1 = params["w1"].shape
    fc2 = params["w2"].shape[1]
    W = max(D, fc1, fc2)

    norm = jnp.asarray(norm, jnp.float32).reshape(1, D)
    if bool(jnp.any(norm == 0.0)):   # fail loudly instead of silent inf/nan
        raise ValueError("CriticNetwork normalization vector contains zeros")
    inv_norm = 1.0 / norm

    def row(v):
        v = jnp.asarray(v, jnp.float32).reshape(1, -1)
        return jnp.pad(v, ((0, 0), (0, W - v.shape[1])))

    packed = jnp.concatenate(
        [row(params["b1"]), row(params["b2"]), row(params["w3"]),
         row(params["b3"]), row(inv_norm)], axis=0)           # (5, W) f32

    return {
        "w1": params["w1"].astype(jnp.bfloat16),               # (D, fc1)
        "w2": params["w2"].astype(jnp.bfloat16),               # (fc1, fc2)
        "packed": packed,
        "dims": (D, fc1, fc2, W),
    }


def critic_forward(state, prepped, *, tile_b=2048, single_tile_max=1024):
    """state: (B, D) f32; prepped: output of prepare_critic_params.

    Returns (B, 1) f32 values (same as the PyTorch module)."""
    B, D = state.shape
    Dp, fc1, fc2, W = prepped["dims"]
    assert D == Dp, (D, Dp)

    x = state.astype(jnp.float32)

    # Batch tiling (see header comment for rationale / VMEM bounds).
    if B <= single_tile_max:
        nb, tb, Bp = 1, B, B
    else:
        nb = max(2, pl.cdiv(B, tile_b))          # >= 2 steps: both v7x TCs work
        tb = _round_up(pl.cdiv(B, nb), 8)        # f32 sublane constraint
        nb = pl.cdiv(B, tb)
        Bp = nb * tb
    if Bp != B:
        x = jnp.pad(x, ((0, Bp - B), (0, 0)))    # garbage rows sliced off below

    const = lambda shape: pl.BlockSpec(shape, lambda i: (0, 0))

    out = pl.pallas_call(
        critic_kernel,
        out_shape=jax.ShapeDtypeStruct((Bp, 1), jnp.float32),
        grid=(nb,),
        in_specs=[
            pl.BlockSpec((tb, D), lambda i: (i, 0)),   # state tile (f32)
            const((D, fc1)),                           # w1 (bf16), grid-invariant
            const((fc1, fc2)),                         # w2 (bf16), grid-invariant
            const((5, W)),                             # packed b1/b2/w3/b3/1-over-norm
        ],
        out_specs=pl.BlockSpec((tb, 1), lambda i: (i, 0)),
        compiler_params=pltpu.CompilerParams(
            dimension_semantics=("parallel",)),
    )(x, prepped["w1"], prepped["w2"], prepped["packed"])
    return out[:B]


def make_norm_vector(settings, n_sats):
    vals = []
    for _ in range(n_sats):
        vals.append(86400.0 * settings['time']['duration']
                    / settings['time']['step_size'])
        vals.append(settings['instrument']['ffor'] / 2.0)
        vals.append(180.0)
        vals.append(180.0)
        vals.append(float(n_sats))
    return jnp.asarray(vals, dtype=jnp.float32)[None, :]   # (1, D)


def init_params(key, input_dims, fc1_dims=256, fc2_dims=256):
    """Deterministic init matching PyTorch nn.Linear default:
    U(-1/sqrt(in), 1/sqrt(in)).  Weights stored as (in_features, out_features)."""
    ks = jax.random.split(key, 6)

    def lin(kw, kb, n_in, n_out):
        bound = 1.0 / jnp.sqrt(jnp.float32(n_in))
        w = jax.random.uniform(kw, (n_in, n_out), jnp.float32, -bound, bound)
        b = jax.random.uniform(kb, (1, n_out), jnp.float32, -bound, bound)
        return w, b

    w1, b1 = lin(ks[0], ks[1], input_dims, fc1_dims)
    w2, b2 = lin(ks[2], ks[3], fc1_dims, fc2_dims)
    w3, b3 = lin(ks[4], ks[5], fc2_dims, 1)
    return {"w1": w1, "b1": b1, "w2": w2, "b2": b2, "w3": w3, "b3": b3}


if __name__ == "__main__":
    # Small synthetic configuration.
    settings = {
        "time": {"duration": 1.0, "step_size": 10.0},
        "instrument": {"ffor": 60.0},
    }
    n_sats = 5
    input_dims = 5 * n_sats     # 25 features: 5 per satellite
    batch = 8

    key = jax.random.PRNGKey(0)
    k_state, k_params = jax.random.split(key)

    state = jax.random.normal(k_state, (batch, input_dims), dtype=jnp.float32) * 100.0
    norm = make_norm_vector(settings, n_sats)
    params = init_params(k_params, input_dims)

    # Weight prep is done once (outside the per-step hot path).
    prepped = prepare_critic_params(params, norm)

    value = critic_forward(state, prepped)
    value = jax.block_until_ready(value)
    assert value.shape == (batch, 1)

    # Reference 1: mirror the kernel's precision exactly (f32 normalize via
    # 1/norm multiply, bf16 MXU operands, f32 accumulation) — tight tolerance.
    inv = 1.0 / norm
    x_bf = (state * inv).astype(jnp.bfloat16)
    h1 = jnp.maximum(
        jnp.dot(x_bf, params["w1"].astype(jnp.bfloat16),
                preferred_element_type=jnp.float32) + params["b1"], 0.0)
    h2 = jnp.maximum(
        jnp.dot(h1.astype(jnp.bfloat16), params["w2"].astype(jnp.bfloat16),
                preferred_element_type=jnp.float32) + params["b2"], 0.0)
    ref_bf16 = (jnp.sum(h2 * params["w3"].reshape(1, -1), axis=-1, keepdims=True)
                + params["b3"])
    assert jnp.allclose(value, ref_bf16, atol=1e-3, rtol=1e-3)

    # Reference 2: full-f32 PyTorch-equivalent math — loose tolerance
    # (bf16 matmul operands in the kernel).
    xf = state / norm
    h1f = jnp.maximum(xf @ params["w1"] + params["b1"], 0.0)
    h2f = jnp.maximum(h1f @ params["w2"] + params["b2"], 0.0)
    ref_f32 = h2f @ params["w3"] + params["b3"]
    assert jnp.allclose(value, ref_f32, atol=0.1, rtol=0.05)

    print("KERNEL_OK")
</pallas_src>

<mosaic_0001>
module attributes {stable_mosaic.version = 11 : i64} {
  func.func @critic_kernel(%arg0: i32, %arg1: memref<8x25xf32, #tpu.memory_space<vmem>>, %arg2: memref<25x256xbf16, #tpu.memory_space<vmem>>, %arg3: memref<256x256xbf16, #tpu.memory_space<vmem>>, %arg4: memref<5x256xf32, #tpu.memory_space<vmem>>, %arg5: memref<8x1xf32, #tpu.memory_space<vmem>>) attributes {dimension_semantics = [#tpu.dimension_semantics<parallel>], iteration_bounds = array<i64: 1>, scalar_prefetch = 0 : i64, scratch_operands = 0 : i64, tpu.core_type = #tpu.core_type<tc>, window_params = [{transform_indices = @transform_0, window_bounds = array<i64: 8, 25>}, {pipeline_mode = #tpu.pipeline_mode<synchronous>, transform_indices = @transform_1, window_bounds = array<i64: 25, 256>}, {pipeline_mode = #tpu.pipeline_mode<synchronous>, transform_indices = @transform_2, window_bounds = array<i64: 256, 256>}, {pipeline_mode = #tpu.pipeline_mode<synchronous>, transform_indices = @transform_3, window_bounds = array<i64: 5, 256>}, {transform_indices = @transform_4, window_bounds = array<i64: 8, 1>}]} {
    %c0 = arith.constant 0 : index
    %c0_0 = arith.constant 0 : index
    %0 = vector.load %arg4[%c0, %c0_0] : memref<5x256xf32, #tpu.memory_space<vmem>>, vector<1x256xf32>
    %c1 = arith.constant 1 : index
    %c0_1 = arith.constant 0 : index
    %1 = vector.load %arg4[%c1, %c0_1] : memref<5x256xf32, #tpu.memory_space<vmem>>, vector<1x256xf32>
    %c2 = arith.constant 2 : index
    %c0_2 = arith.constant 0 : index
    %2 = vector.load %arg4[%c2, %c0_2] : memref<5x256xf32, #tpu.memory_space<vmem>>, vector<1x256xf32>
    %c3 = arith.constant 3 : index
    %c0_3 = arith.constant 0 : index
    %3 = vector.load %arg4[%c3, %c0_3] : memref<5x256xf32, #tpu.memory_space<vmem>>, vector<1x1xf32>
    %c4 = arith.constant 4 : index
    %c0_4 = arith.constant 0 : index
    %4 = vector.load %arg4[%c4, %c0_4] : memref<5x256xf32, #tpu.memory_space<vmem>>, vector<1x25xf32>
    %c0_5 = arith.constant 0 : index
    %c0_6 = arith.constant 0 : index
    %5 = vector.load %arg1[%c0_5, %c0_6] : memref<8x25xf32, #tpu.memory_space<vmem>>, vector<8x25xf32>
    %6 = vector.broadcast %4 : vector<1x25xf32> to vector<8x25xf32>
    %7 = arith.mulf %5, %6 : vector<8x25xf32>
    %8 = arith.truncf %7 : vector<8x25xf32> to vector<8x25xbf16>
    %c0_7 = arith.constant 0 : index
    %c0_8 = arith.constant 0 : index
    %9 = vector.load %arg2[%c0_7, %c0_8] : memref<25x256xbf16, #tpu.memory_space<vmem>>, vector<25x256xbf16>
    %cst = arith.constant dense<0.000000e+00> : vector<8x256xf32>
    %10 = tpu.matmul %8, %9, %cst {dimension_numbers = #tpu.dot_dimension_numbers<[1], [0], [0], [1], [0, 0, 1, 1], [], []>} : vector<8x25xbf16>, vector<25x256xbf16>, vector<8x256xf32> -> vector<8x256xf32>
    %11 = vector.broadcast %0 : vector<1x256xf32> to vector<8x256xf32>
    %12 = arith.addf %10, %11 : vector<8x256xf32>
    %cst_9 = arith.constant 0.000000e+00 : f32
    %13 = vector.broadcast %cst_9 : f32 to vector<8x256xf32>
    %14 = arith.maximumf %12, %13 : vector<8x256xf32>
    %15 = arith.truncf %14 : vector<8x256xf32> to vector<8x256xbf16>
    %c0_10 = arith.constant 0 : index
    %c0_11 = arith.constant 0 : index
    %16 = vector.load %arg3[%c0_10, %c0_11] : memref<256x256xbf16, #tpu.memory_space<vmem>>, vector<256x256xbf16>
    %cst_12 = arith.constant dense<0.000000e+00> : vector<8x256xf32>
    %17 = tpu.matmul %15, %16, %cst_12 {dimension_numbers = #tpu.dot_dimension_numbers<[1], [0], [0], [1], [0, 0, 1, 1], [], []>} : vector<8x256xbf16>, vector<256x256xbf16>, vector<8x256xf32> -> vector<8x256xf32>
    %18 = vector.broadcast %1 : vector<1x256xf32> to vector<8x256xf32>
    %19 = arith.addf %17, %18 : vector<8x256xf32>
    %cst_13 = arith.constant 0.000000e+00 : f32
    %20 = vector.broadcast %cst_13 : f32 to vector<8x256xf32>
    %21 = arith.maximumf %19, %20 : vector<8x256xf32>
    %22 = vector.broadcast %2 : vector<1x256xf32> to vector<8x256xf32>
    %23 = arith.mulf %21, %22 : vector<8x256xf32>
    %cst_14 = arith.constant dense<0.000000e+00> : vector<8xf32>
    %24 = vector.multi_reduction <add>, %23, %cst_14 [1] : vector<8x256xf32> to vector<8xf32>
    %25 = vector.shape_cast %24 : vector<8xf32> to vector<8x1xf32>
    %26 = vector.broadcast %3 : vector<1x1xf32> to vector<8x1xf32>
    %27 = arith.addf %25, %26 : vector<8x1xf32>
    %c0_15 = arith.constant 0 : index
    %c0_16 = arith.constant 0 : index
    %28 = vector.load %arg5[%c0_15, %c0_16] : memref<8x1xf32, #tpu.memory_space<vmem>>, vector<8x1xf32>
    tpu.vector_store %arg5[%c0_15, %c0_16], %27 {strides = array<i32>} : memref<8x1xf32, #tpu.memory_space<vmem>>, vector<8x1xf32>,
    return
  }
  func.func @transform_0(%arg0: i32) -> (i32, i32) {
    %c0_i32 = arith.constant 0 : i32
    %c0_i32_0 = arith.constant 0 : i32
    return %arg0, %c0_i32 : i32, i32
  }
  func.func @transform_1(%arg0: i32) -> (i32, i32) {
    %c0_i32 = arith.constant 0 : i32
    %c0_i32_0 = arith.constant 0 : i32
    %c0_i32_1 = arith.constant 0 : i32
    return %c0_i32, %c0_i32_0 : i32, i32
  }
  func.func @transform_2(%arg0: i32) -> (i32, i32) {
    %c0_i32 = arith.constant 0 : i32
    %c0_i32_0 = arith.constant 0 : i32
    %c0_i32_1 = arith.constant 0 : i32
    return %c0_i32, %c0_i32_0 : i32, i32
  }
  func.func @transform_3(%arg0: i32) -> (i32, i32) {
    %c0_i32 = arith.constant 0 : i32
    %c0_i32_0 = arith.constant 0 : i32
    %c0_i32_1 = arith.constant 0 : i32
    return %c0_i32, %c0_i32_0 : i32, i32
  }
  func.func @transform_4(%arg0: i32) -> (i32, i32) {
    %c0_i32 = arith.constant 0 : i32
    %c0_i32_0 = arith.constant 0 : i32
    return %arg0, %c0_i32 : i32, i32
  }
}

</mosaic_0001>

<bundles_post_ra>
// kernel: tpu_custom_call.1
= control target key start
LH: loop header
LB: loop body
LE: loop exit
PB: predicated region body
PF: predicated region fallthrough
CT: control target
= control target key end

     0   :  { %9 = vsyncpa [#allocation3], 0  ;;  %s676_s0 = inlined_call_operand.hbm [shape: f32[8,25], index: 0, kind: input, shape index: {}]   ;;  %s677_s1 = inlined_call_operand.hbm [shape: bf16[25,256], index: 1, kind: input, shape index: {}]   ;;  %s678_s2 = inlined_call_operand.hbm [shape: bf16[256,256], index: 2, kind: input, shape index: {}]   ;;  %s679_s3 = inlined_call_operand.hbm [shape: f32[5,256], index: 3, kind: input, shape index: {}]   ;;  %s680_s4 = inlined_call_operand.vmem [shape: f32[8,1], index: 4, kind: output, shape index: {}]  }
   0x1   :  { %10 = vsyncpa [#allocation5], 0 }
   0x2   :  { %11 = vsyncpa [#allocation8], 0  ;;  %s628_s15 = smov [#allocation4]  }
   0x3   :  { %s27_s16 = sshll.u32 %s628_s15, 4  ;;  %s28_s16 = int_to_ptr.vmem [resolvable:$true] %s27_s16 }
   0x4   :  { %s550_s17 = scalar_lea.vmem %s28_s16, 512  ;;  %p555_p1 = scmp.lt.s32.totalorder %s28_s16, %s28_s16 }
   0x5   :  { %p551_p0 = scmp.ne.s32.totalorder %s28_s16, %s550_s17  ;;  %p556_p2 = scmp.lt.s32.totalorder %s550_s17, %s550_s17 }
   0x7   :  { %p557_p3 = por %p556_p2, %p555_p1 }
   0x9   :  { %p558_p4 = pnand %p557_p3, %p551_p0 }
   0xb   :  { %561 = shalt.err (!%p558_p4)
}
   0xc   :  { %s629_s18 = smov 128   ;;  %s630_s19 = smov 8  }
   0xd   :  { %33 = dma.hbm_to_vmem [thread:$0]  %s677_s1, 512, %s28_s16, [#allocation5], %s629_s18, %s629_s18, %s630_s19  }
   0xe   :  { %s631_s22 = smov [#allocation2]   ;;  %s632_s24 = smov [#allocation6]  }
   0xf   :  { %s18_s23 = sshll.u32 %s631_s22, 4  ;;  %s39_s25 = sshll.u32 %s632_s24, 4  ;;  %s19_s23 = int_to_ptr.vmem [resolvable:$true] %s18_s23  ;;  %s40_s25 = int_to_ptr.vmem [resolvable:$true] %s39_s25 }
  0x10   :  { %s570_s26 = scalar_lea.vmem %s19_s23, 128  ;;  %p575_p6 = scmp.lt.s32.totalorder %s19_s23, %s19_s23 }
  0x11   :  { %p571_p5 = scmp.ne.s32.totalorder %s19_s23, %s570_s26  ;;  %p576_p7 = scmp.lt.s32.totalorder %s570_s26, %s570_s26 }
  0x13   :  { %p577_p8 = por %p576_p7, %p575_p6 }
  0x15   :  { %p578_p9 = pnand %p577_p8, %p571_p5 }
  0x17   :  { %581 = shalt.err (!%p578_p9)
}
  0x18   :  { %21 = dma.hbm_to_vmem [thread:$0]  %s676_s0, 128, %s19_s23, [#allocation3]  }
  0x19   :  { %s590_s29 = scalar_lea.vmem %s40_s25, 4096  ;;  %p595_p11 = scmp.lt.s32.totalorder %s40_s25, %s40_s25 }
  0x1a   :  { %p591_p10 = scmp.ne.s32.totalorder %s40_s25, %s590_s29  ;;  %p596_p12 = scmp.lt.s32.totalorder %s590_s29, %s590_s29 }
  0x1c   :  { %p597_p13 = por %p596_p12, %p595_p11 }
  0x1e   :  { %p598_p0 = pnand %p597_p13, %p591_p10 }
  0x20   :  { %601 = shalt.err (!%p598_p0)
}
  0x21   :  { %45 = dma.hbm_to_vmem [thread:$0]  %s678_s2, 4096, %s40_s25, [#allocation5], %s629_s18, %s629_s18, %s630_s19  }
  0x22   :  { %s633_s5 = smov [#allocation7]  }
  0x23   :  { %s52_s6 = sshll.u32 %s633_s5, 4  ;;  %s53_s6 = int_to_ptr.vmem [resolvable:$true] %s52_s6 }
  0x24   :  { %s610_s7 = scalar_lea.vmem %s53_s6, 256  ;;  %p615_p2 = scmp.lt.s32.totalorder %s53_s6, %s53_s6 }
  0x25   :  { %p611_p1 = scmp.ne.s32.totalorder %s53_s6, %s610_s7  ;;  %p616_p3 = scmp.lt.s32.totalorder %s610_s7, %s610_s7 }
  0x27   :  { %p617_p4 = por %p616_p3, %p615_p2 }
  0x29   :  { %p618_p5 = pnand %p617_p4, %p611_p1 }
  0x2b   :  { %621 = shalt.err (!%p618_p5)
}
  0x2c   :  { %55 = dma.hbm_to_vmem [thread:$0]  %s679_s3, 256, %s53_s6, [#allocation8]  }
  0x2d   :  { %622 = dma.done.wait [#allocation3], 128  }
  0x2e   :  { %623 = vsyncadd [#allocation3], 4294967168 }
  0x2f   :  { %624 = dma.done.wait [#allocation5], 4608  }
  0x30   :  { %625 = vsyncadd [#allocation5], 4294962688 }
  0x31   :  { %626 = dma.done.wait [#allocation8], 256  }
  0x32   :  { %627 = vsyncadd [#allocation8], 4294967040  ;;  %vm116_vm0 = vcmask 1043456   ;;  %v634_v0 = vmov 0   ;;  %vm117_vm1 = vcmask 1044480   ;;  %v635_v1 = vmov 65535  }
  0x33   :  { %158 = vmatprep.mubr.bf16.mxu0 %v634_v0  ;;  %v118_v2 = vsel %vm116_vm0, 4294967295, %v635_v1  ;;  %v488_v4 = vld [vmem:[#allocation4 + $0x14] ss:$8 sps:$4 sm:$0x1f]   ;;  %v491_v7 = vld [vmem:[#allocation4 + $0x4] ss:$8 sps:$4 sm:$0xff]   ;;  %v84_v46 = vlaneseq }
  0x34   :  { %v119_v3 = vsel %vm117_vm1, %v118_v2, 0  ;;  %v490_v5 = vld [vmem:[#allocation4 + $0x10] ss:$8 sps:$4 sm:$0x1f]   ;;  %v75_v8 = vld [vmem:[#allocation7 + $0x4] ss:$0 sm:$0xff] }
  0x35   :  { %v124_v6 = vand.u32 %v488_v4, %v119_v3  ;;  %v121_v9 = vand.u32 %v490_v5, %v119_v3  ;;  %v76_v10 = vld [vmem:[#allocation2] sm:$0xff]  ;;  %v493_v14 = vld [vmem:[#allocation4] ss:$8 sps:$4 sm:$0xff]   ;;  %v497_v15 = vld [vmem:[#allocation6 + $0x64] ss:$8 sps:$4 sm:$0xff]   ;;  %vm112_vm2 = vcmask 203776  }
  0x36   :  { %v77_v11 = vmul.f32 %v76_v10, %v75_v8  ;;  %v494_v12 = vld [vmem:[#allocation6 + $0x74] ss:$8 sps:$4 sm:$0xff]   ;;  %v496_v13 = vld [vmem:[#allocation6 + $0x70] ss:$8 sps:$4 sm:$0xff]   ;;  %v499_v16 = vld [vmem:[#allocation6 + $0x60] ss:$8 sps:$4 sm:$0xff]  }
  0x37   :  { %138 = vmatprep.subr.bf16.mxu0 %v124_v6  ;;  %374 = vmatprep.subr.bf16.mxu1 %v494_v12  ;;  %v500_v18 = vld [vmem:[#allocation6 + $0x54] ss:$8 sps:$4 sm:$0xff]   ;;  %v502_v19 = vld [vmem:[#allocation6 + $0x50] ss:$8 sps:$4 sm:$0xff]   ;;  %v503_v20 = vld [vmem:[#allocation6 + $0x44] ss:$8 sps:$4 sm:$0xff]  }
  0x38   :  { %139 = vmatpush1.bf16.msra.mxu0 %v121_v9  ;;  %375 = vmatpush1.bf16.msra.mxu1 %v496_v13  ;;  %v78_v17 = vpack.c.bf16 %v77_v11, %v77_v11  ;;  %v505_v21 = vld [vmem:[#allocation6 + $0x40] ss:$8 sps:$4 sm:$0xff]   ;;  %v506_v22 = vld [vmem:[#allocation6 + $0x34] ss:$8 sps:$4 sm:$0xff]   ;;  %v508_v23 = vld [vmem:[#allocation6 + $0x30] ss:$8 sps:$4 sm:$0xff]  }
  0x39   :  { %140 = vmatprep.subr.bf16.mxu0 %v491_v7  ;;  %376 = vmatprep.subr.bf16.mxu1 %v497_v15  ;;  %v509_v24 = vld [vmem:[#allocation6 + $0x24] ss:$8 sps:$4 sm:$0xff]   ;;  %v511_v25 = vld [vmem:[#allocation6 + $0x20] ss:$8 sps:$4 sm:$0xff]   ;;  %v512_v26 = vld [vmem:[#allocation6 + $0x14] ss:$8 sps:$4 sm:$0xff]  }
  0x3a   :  { %v514_v27 = vld [vmem:[#allocation6 + $0x10] ss:$8 sps:$4 sm:$0xff]   ;;  %v515_v28 = vld [vmem:[#allocation6 + $0x4] ss:$8 sps:$4 sm:$0xff]   ;;  %v517_v29 = vld [vmem:[#allocation6] ss:$8 sps:$4 sm:$0xff]  }
  0x3b   :  { %v518_v30 = vld [vmem:[#allocation6 + $0xf4] ss:$8 sps:$4 sm:$0xff]   ;;  %v520_v31 = vld [vmem:[#allocation6 + $0xf0] ss:$8 sps:$4 sm:$0xff]   ;;  %v521_v32 = vld [vmem:[#allocation6 + $0xe4] ss:$8 sps:$4 sm:$0xff]  }
  0x3c   :  { %141 = vmatpush1.bf16.msra.mxu0 %v493_v14  ;;  %377 = vmatpush1.bf16.msra.mxu1 %v499_v16  ;;  %v523_v33 = vld [vmem:[#allocation6 + $0xe0] ss:$8 sps:$4 sm:$0xff]   ;;  %v524_v34 = vld [vmem:[#allocation6 + $0xd4] ss:$8 sps:$4 sm:$0xff]   ;;  %v526_v35 = vld [vmem:[#allocation6 + $0xd0] ss:$8 sps:$4 sm:$0xff]  }
  0x3d   :  { %378 = vmatprep.subr.bf16.mxu1 %v500_v18  ;;  %v527_v36 = vld [vmem:[#allocation6 + $0xc4] ss:$8 sps:$4 sm:$0xff]   ;;  %v529_v37 = vld [vmem:[#allocation6 + $0xc0] ss:$8 sps:$4 sm:$0xff]   ;;  %v530_v38 = vld [vmem:[#allocation6 + $0xb4] ss:$8 sps:$4 sm:$0xff]  }
  0x3e   :  { %v532_v39 = vld [vmem:[#allocation6 + $0xb0] ss:$8 sps:$4 sm:$0xff]   ;;  %v533_v40 = vld [vmem:[#allocation6 + $0xa4] ss:$8 sps:$4 sm:$0xff]   ;;  %v535_v41 = vld [vmem:[#allocation6 + $0xa0] ss:$8 sps:$4 sm:$0xff]  }
  0x3f   :  { %447 = vmatmul.mubr.msk.bf16.vlgmr.msra.gmra.mxu0 %vm112_vm2, %v78_v17  ;;  %v536_v42 = vld [vmem:[#allocation6 + $0x94] ss:$8 sps:$4 sm:$0xff]   ;;  %v538_v43 = vld [vmem:[#allocation6 + $0x90] ss:$8 sps:$4 sm:$0xff]   ;;  %v539_v44 = vld [vmem:[#allocation6 + $0x84] ss:$8 sps:$4 sm:$0xff]  }
  0x40   :  { %379 = vmatpush1.bf16.msra.mxu1 %v502_v19  ;;  %v541_v45 = vld [vmem:[#allocation6 + $0x80] ss:$8 sps:$4 sm:$0xff]   ;;  %v85_v47 = vshrl.u32 %v84_v46, 7  ;;  %vm434_vm3 = vcmask 7168  }
  0x41   :  { %380 = vmatprep.subr.bf16.mxu1 %v503_v20  ;;  %v69_v49 = vld [vmem:[#allocation7] ss:$8 sm:$0x3]  ;;  %v71_v63 = vld [vmem:[#allocation7 + $0x1] ss:$8 sm:$0x3] }
  0x42   :  { %v86_v48 = vsub.s32 0, %v85_v47  ;;  %v90_v50 = vsub.s32 1, %v85_v47  ;;  %v73_v3 = vld [vmem:[#allocation7 + $0x2] ss:$8 sm:$0x3] }
  0x43   :  { %v74_v16 = vld [vmem:[#allocation7 + $0x3] ss:$0 sm:$0xff] }
  0x44   :  { %381 = vmatpush1.bf16.msra.mxu1 %v505_v21  ;;  %v87_v51 = vrot.slane %v69_v49, %v86_v48  ;;  %v91_v52 = vrot.slane %v69_v49, %v90_v50  ;;  %v207_v0 = vrot.slane %v71_v63, %v86_v48  ;;  %v211_v1 = vrot.slane %v71_v63, %v90_v50 }
  0x45   :  { %382 = vmatprep.subr.bf16.mxu1 %v506_v22  ;;  %v421_v8 = vrot.slane %v73_v3, %v86_v48  ;;  %v425_v9 = vrot.slane %v73_v3, %v90_v50 }
  0x48   :  { %383 = vmatpush1.bf16.msra.mxu1 %v508_v23 }
  0x49   :  { %384 = vmatprep.subr.bf16.mxu1 %v509_v24 }
  0x4c   :  { %385 = vmatpush1.bf16.msra.mxu1 %v511_v25 }
  0x4d   :  { %386 = vmatprep.subr.bf16.mxu1 %v512_v26 }
  0x50   :  { %387 = vmatpush1.bf16.msra.mxu1 %v514_v27 }
  0x51   :  { %388 = vmatprep.subr.bf16.mxu1 %v515_v28 }
  0x54   :  { %389 = vmatpush1.bf16.msra.mxu1 %v517_v29 }
  0x55   :  { %390 = vmatprep.subr.bf16.mxu1 %v518_v30 }
  0x58   :  { %391 = vmatpush2.bf16.msra.mxu1 %v520_v31 }
  0x59   :  { %392 = vmatprep.subr.bf16.mxu1 %v521_v32 }
  0x5c   :  { %393 = vmatpush2.bf16.msra.mxu1 %v523_v33 }
  0x5d   :  { %394 = vmatprep.subr.bf16.mxu1 %v524_v34 }
  0x60   :  { %395 = vmatpush2.bf16.msra.mxu1 %v526_v35 }
  0x61   :  { %396 = vmatprep.subr.bf16.mxu1 %v527_v36 }
  0x64   :  { %397 = vmatpush2.bf16.msra.mxu1 %v529_v37 }
  0x65   :  { %398 = vmatprep.subr.bf16.mxu1 %v530_v38 }
  0x68   :  { %399 = vmatpush2.bf16.msra.mxu1 %v532_v39 }
  0x69   :  { %400 = vmatprep.subr.bf16.mxu1 %v533_v40 }
  0x6c   :  { %401 = vmatpush2.bf16.msra.mxu1 %v535_v41 }
  0x6d   :  { %402 = vmatprep.subr.bf16.mxu1 %v536_v42 }
  0x70   :  { %403 = vmatpush2.bf16.msra.mxu1 %v538_v43 }
  0x71   :  { %404 = vmatprep.subr.bf16.mxu1 %v539_v44 }
  0x74   :  { %405 = vmatpush2.bf16.msra.mxu1 %v541_v45 }
  0xff   :  { %v160_v53 = vpop.f32.mrf.mxu0 }
 0x100   :  { %v161_v54 = vadd.f32 %v160_v53, %v87_v51 }
 0x101   :  { %v162_v55 = vpop.f32.mrf.mxu0 }
 0x102   :  { %v163_v56 = vadd.f32 %v162_v55, %v91_v52  ;;  %v167_v57 = vmax.f32 %v161_v54, 0.0 }
 0x103   :  { %v164_v58 = vpop.f32.mrf.mxu0 }
 0x104   :  { %v168_v59 = vmax.f32 %v163_v56, 0.0  ;;  %v169_v62 = vpack.c.bf16 %v167_v57, %v167_v57 }
 0x105   :  { %v165_v60 = vpop.f32.mrf.mxu0 }
 0x106   :  { %v170_v61 = vpack.c.bf16 %v168_v59, %v168_v59 }
 0x108   :  { %406 = vmatprep.mubr.bf16.mxu1 %v170_v61 }
 0x109   :  { %407 = vmatmul.mubr.bf16.vlgmr.msra.gmra.mxu1 %v169_v62 }
 0x1c9   :  { %v408_v2 = vpop.f32.mrf.mxu1 }
 0x1ca   :  { %v409_v4 = vadd.f32 %v408_v2, %v207_v0 }
 0x1cb   :  { %v410_v5 = vpop.f32.mrf.mxu1 }
 0x1cc   :  { %v415_v6 = vmax.f32 %v409_v4, 0.0  ;;  %v411_v7 = vadd.f32 %v410_v5, %v211_v1 }
 0x1cd   :  { %v412_v10 = vpop.f32.mrf.mxu1 }
 0x1ce   :  { %v416_v11 = vmax.f32 %v411_v7, 0.0  ;;  %v428_v13 = vmul.f32 %v421_v8, %v415_v6 }
 0x1cf   :  { %v413_v12 = vpop.f32.mrf.mxu1 }
 0x1d0   :  { %v429_v14 = vmul.f32 %v425_v9, %v416_v11 }
 0x1d2   :  { %v430_v15 = vadd.f32 %v429_v14, %v428_v13 }
 0x1d4   :  { %431 = vadd.xlane.f32.xlu0 %v430_v15 }
 0x25d   :  { %v432_v17 = vpop.xlane.xlu0 %431 }
 0x25e   :  { %v433_v18 = vadd.f32 %v432_v17, %v74_v16 }
 0x260   :  { %435 = vst.msk [vmem:[%s680_s4] sm:$0xff] %vm434_vm3, %v433_v18 }
 0x261   :  { %440 = vsyncpa [#allocation3], 1 }
 0x262   :  { %441 = vsyncpa [#allocation5], 1 }
 0x263   :  { %442 = vsyncpa [#allocation8], 1 }

</bundles_post_ra>
